<compile_context>
chip_gen: v5e
topology: v5e:2x2
jax: 0.10.0
libtpu: 0.0.40
codegen_flags: <defaults>
</compile_context>

<pallas_src>
import jax
import jax.numpy as jnp
from jax.experimental import pallas as pl
from jax.experimental.pallas import tpu as pltpu


def _round_up(n, m):
    return (n + m - 1) // m * m


# ---------------------------------------------------------------------------
# One-time (module import) hardware / feature probes.
# ---------------------------------------------------------------------------
def _probe_vmem_bytes():
    try:
        info = pltpu.get_tpu_info()
        for name in ("vmem_capacity_bytes", "vmem_bytes", "vmem_size_bytes"):
            v = getattr(info, name, None)
            if v:
                return int(v)
    except Exception:
        pass
    return 64 * 1024 * 1024  # conservative default (v7x per-TensorCore VMEM)


def _probe_num_tensorcores():
    try:
        info = pltpu.get_tpu_info()
        for name in ("num_cores", "num_tensorcores", "tensorcores_per_chip"):
            v = getattr(info, name, None)
            if v:
                return int(v)
    except Exception:
        pass
    try:
        dev = jax.devices()[0]
        v = getattr(dev, "num_cores", None)
        if v:
            return int(v)
        kind = str(getattr(dev, "device_kind", "")).lower()
        if "v7" in kind:
            return 2
    except Exception:
        pass
    return 1  # safe default: never force a megacore split


def _probe_single_buffer_weights():
    """True iff this build accepts pl.Buffered(1) on grid-invariant inputs."""
    try:
        if jax.devices()[0].platform != "tpu":
            return False

        def k(x_ref, w_ref, o_ref):
            o_ref[...] = x_ref[...] + w_ref[...]

        f = pl.pallas_call(
            k,
            out_shape=jax.ShapeDtypeStruct((16, 128), jnp.float32),
            grid_spec=pltpu.PrefetchScalarGridSpec(
                num_scalar_prefetch=0,
                grid=(2,),
                in_specs=[
                    pl.BlockSpec((8, 128), lambda i: (i, 0)),
                    pl.BlockSpec((8, 128), lambda i: (0, 0),
                                 pipeline_mode=pl.Buffered(1)),
                ],
                out_specs=pl.BlockSpec((8, 128), lambda i: (i, 0)),
            ),
        )
        x = jnp.zeros((16, 128), jnp.float32)
        w = jnp.zeros((8, 128), jnp.float32)
        jax.jit(f).lower(x, w).compile()
        return True
    except Exception:
        return False


_VMEM_BYTES = _probe_vmem_bytes()
_NUM_TENSORCORES = _probe_num_tensorcores()
_SINGLE_BUFFER_WEIGHTS = _probe_single_buffer_weights()
_VMEM_BUDGET = int(_VMEM_BYTES * 0.80)  # headroom for Mosaic internal scratch


# ---------------------------------------------------------------------------
# Kernels.
# ---------------------------------------------------------------------------
def _ffn_fused_kernel(x_ref, w1_ref, b1_ref, w2_ref, b2_ref, o_ref):
    # x_ref:  (TM, IN_P)   native dtype (f32) input row tile -> cast in-kernel
    # w1_ref: (IN_P, HID_P)  bf16 resident   b1_ref: (1, HID_P) f32
    # w2_ref: (HID_P, HID_P) bf16 resident   b2_ref: (1, HID_P) f32
    # o_ref:  (TM, HID_P)   output row tile
    x = x_ref[...].astype(w1_ref.dtype)
    h = jnp.dot(x, w1_ref[...], preferred_element_type=jnp.float32)
    h = jnp.maximum(h + b1_ref[...], 0.0)                       # bias + ReLU in f32
    o = jnp.dot(h.astype(w2_ref.dtype), w2_ref[...],
                preferred_element_type=jnp.float32)
    o_ref[...] = jnp.maximum(o + b2_ref[...], 0.0).astype(o_ref.dtype)


def _linear_relu_kernel(x_ref, w_ref, b_ref, o_ref, acc_ref):
    # Tiled relu(x @ w + b) with K-reduction on the last grid axis.
    @pl.when(pl.program_id(2) == 0)
    def _():
        acc_ref[...] = jnp.zeros_like(acc_ref)

    acc_ref[...] += jnp.dot(x_ref[...].astype(w_ref.dtype), w_ref[...],
                            preferred_element_type=jnp.float32)

    @pl.when(pl.program_id(2) == pl.num_programs(2) - 1)
    def _():
        o_ref[...] = jnp.maximum(acc_ref[...] + b_ref[...], 0.0).astype(o_ref.dtype)


def _linear_relu(x, w, b, out_dtype, *, tm=256, tn=512, tk=512):
    """Tiled y = relu(x @ w + b).  x:(M,K), w:(K,N) bf16, b:(1,N) f32."""
    M, K = x.shape
    N = w.shape[1]
    tm = min(tm, _round_up(M, 8))
    tn = min(tn, _round_up(N, 128))
    tk = min(tk, _round_up(K, 128))
    Mp, Kp, Np = _round_up(M, tm), _round_up(K, tk), _round_up(N, tn)
    x = jnp.pad(x, ((0, Mp - M), (0, Kp - K)))
    w = jnp.pad(w, ((0, Kp - K), (0, Np - N)))
    b = jnp.pad(b, ((0, 0), (0, Np - N)))

    xb = jnp.dtype(x.dtype).itemsize
    wb = jnp.dtype(w.dtype).itemsize
    ob = jnp.dtype(out_dtype).itemsize
    cost = pl.CostEstimate(
        flops=2 * Mp * Kp * Np, transcendentals=0,
        bytes_accessed=Mp * Kp * xb + Kp * Np * wb + Np * 4 + Mp * Np * ob)

    out = pl.pallas_call(
        _linear_relu_kernel,
        out_shape=jax.ShapeDtypeStruct((Mp, Np), out_dtype),
        grid_spec=pltpu.PrefetchScalarGridSpec(
            num_scalar_prefetch=0,
            grid=(Mp // tm, Np // tn, Kp // tk),
            in_specs=[
                pl.BlockSpec((tm, tk), lambda i, j, k: (i, k)),
                pl.BlockSpec((tk, tn), lambda i, j, k: (k, j)),
                pl.BlockSpec((1, tn), lambda i, j, k: (0, j)),
            ],
            out_specs=pl.BlockSpec((tm, tn), lambda i, j, k: (i, j)),
            scratch_shapes=[pltpu.VMEM((tm, tn), jnp.float32)],
        ),
        compiler_params=pltpu.CompilerParams(
            dimension_semantics=("parallel", "parallel", "arbitrary"),
            vmem_limit_bytes=min(_VMEM_BUDGET, 48 << 20),
        ),
        cost_estimate=cost,
    )(x, w, b)
    return out[:M, :N]


# ---------------------------------------------------------------------------
# Public wrapper (jit-friendly: no eager execution, no host sync, no fallback
# try/except — all feature decisions were made once at import).
# ---------------------------------------------------------------------------
def ffn_layer(x, w1, b1, w2, b2, *, compute_dtype=jnp.bfloat16, row_tile_cap=1024):
    """Pallas equivalent of ffnLayer.forward: relu(relu(x @ w1 + b1) @ w2 + b2).

    x:  (..., input_size)
    w1: (input_size, hidden)  b1: (hidden,)   (torch weight transposed)
    w2: (hidden, hidden)      b2: (hidden,)
    returns (..., hidden) in x.dtype
    """
    in_size = x.shape[-1]
    hidden = w1.shape[1]
    lead_shape = x.shape[:-1]
    out_dtype = x.dtype

    x_bytes = jnp.dtype(x.dtype).itemsize
    cd_bytes = jnp.dtype(compute_dtype).itemsize
    out_bytes = jnp.dtype(out_dtype).itemsize

    # Lane-dense feature padding (multiples of 128) -> unmasked stores, full MXU K/N.
    in_p = _round_up(in_size, 128)
    hid_p = _round_up(hidden, 128)

    x2d = x.reshape(-1, in_size)
    n_rows = x2d.shape[0]
    m = _round_up(max(n_rows, 1), 8)

    # One-time weight/bias pad + cast (zero padding is exact; padded lanes/rows
    # are sliced off below).  x stays in its native dtype (cast in-kernel).
    w1p = jnp.pad(w1, ((0, in_p - in_size), (0, hid_p - hidden))).astype(compute_dtype)
    w2p = jnp.pad(w2, ((0, hid_p - hidden), (0, hid_p - hidden))).astype(compute_dtype)
    b1p = jnp.pad(b1, (0, hid_p - hidden)).reshape(1, hid_p).astype(jnp.float32)
    b2p = jnp.pad(b2, (0, hid_p - hidden)).reshape(1, hid_p).astype(jnp.float32)

    # ---- VMEM accounting for the fused weight-stationary path. ----
    n_weight_bufs = 1 if _SINGLE_BUFFER_WEIGHTS else 2
    weight_bytes = (in_p * hid_p + hid_p * hid_p) * cd_bytes + 2 * hid_p * 4
    weight_buf_bytes = n_weight_bufs * weight_bytes

    def _stream_bytes(t):
        # double-buffered x-in / out streams + in-kernel intermediates
        io = 2 * t * in_p * x_bytes + 2 * t * hid_p * out_bytes
        inter = t * in_p * cd_bytes + t * hid_p * (4 + cd_bytes + 4)  # x_bf16, h_f32, h_bf16, o_f32
        return io + inter

    fused_ok = weight_buf_bytes + _stream_bytes(8) <= _VMEM_BUDGET

    if not fused_ok:
        # Weights cannot stay resident (e.g. hidden ~ 4k bf16 on v7x's 64 MiB
        # VMEM): two tiled linear+ReLU passes with accumulator scratch.
        # TODO(synk): the large-weight path round-trips the hidden activation
        # through HBM (two pallas_calls) instead of a fused K/N-tiled single pass.
        xpad = jnp.pad(x2d, ((0, m - n_rows), (0, in_p - in_size)))
        h = _linear_relu(xpad, w1p, b1p, compute_dtype)
        out = _linear_relu(h, w2p, b2p, out_dtype)
        return out[:n_rows, :hidden].reshape(*lead_shape, hidden)

    # ---- Fused path: largest row tile that fits the budget. ----
    row_tile = min(_round_up(m, 8), _round_up(row_tile_cap, 8))
    while row_tile > 8 and weight_buf_bytes + _stream_bytes(row_tile) > _VMEM_BUDGET:
        row_tile = max(8, _round_up(row_tile // 2, 8))

    # Multi-TensorCore (v7x) split: only when per-core compute time exceeds the
    # cost of re-DMAing the resident weights into the second core's VMEM.
    # Single-TC chips (v5e/v6e) keep one maximal tile (the grid is a serial loop).
    if _NUM_TENSORCORES >= 2 and m > 8 and row_tile >= m:
        flops = 2 * m * (in_p * hid_p + hid_p * hid_p)
        per_core_compute_s = (flops / 2) / 900e12      # ~bf16 MXU peak
        extra_weight_dma_s = weight_bytes / 1.4e12     # ~HBM bandwidth
        if per_core_compute_s > extra_weight_dma_s:
            row_tile = _round_up((m + 1) // 2, 8)

    m_pad = _round_up(m, row_tile)
    grid = (m_pad // row_tile,)

    xpad = jnp.pad(x2d, ((0, m_pad - n_rows), (0, in_p - in_size)))

    cost = pl.CostEstimate(
        flops=2 * m_pad * (in_p * hid_p + hid_p * hid_p),
        transcendentals=0,
        bytes_accessed=(m_pad * in_p * x_bytes + weight_bytes
                        + m_pad * hid_p * out_bytes),
    )
    vmem_need = weight_buf_bytes + _stream_bytes(row_tile)
    vmem_limit = int(min(max(vmem_need * 1.15 + (1 << 20), 16 << 20), _VMEM_BUDGET))

    const_kwargs = ({"pipeline_mode": pl.Buffered(1)}
                    if _SINGLE_BUFFER_WEIGHTS else {})

    out = pl.pallas_call(
        _ffn_fused_kernel,
        out_shape=jax.ShapeDtypeStruct((m_pad, hid_p), out_dtype),
        grid_spec=pltpu.PrefetchScalarGridSpec(
            num_scalar_prefetch=0,
            grid=grid,
            in_specs=[
                pl.BlockSpec((row_tile, in_p), lambda i: (i, 0)),                # x (streamed)
                pl.BlockSpec((in_p, hid_p), lambda i: (0, 0), **const_kwargs),   # w1 (resident)
                pl.BlockSpec((1, hid_p), lambda i: (0, 0), **const_kwargs),      # b1 (resident)
                pl.BlockSpec((hid_p, hid_p), lambda i: (0, 0), **const_kwargs),  # w2 (resident)
                pl.BlockSpec((1, hid_p), lambda i: (0, 0), **const_kwargs),      # b2 (resident)
            ],
            out_specs=pl.BlockSpec((row_tile, hid_p), lambda i: (i, 0)),
        ),
        compiler_params=pltpu.CompilerParams(
            dimension_semantics=("parallel",),
            vmem_limit_bytes=vmem_limit,
        ),
        cost_estimate=cost,
    )(xpad, w1p, b1p, w2p, b2p)

    return out[:n_rows, :hidden].reshape(*lead_shape, hidden)


def _torch_linear_init(key, fan_in, fan_out, dtype=jnp.float32):
    """Deterministic init matching nn.Linear's U(-1/sqrt(fan_in), 1/sqrt(fan_in))."""
    kw, kb = jax.random.split(key)
    bound = 1.0 / jnp.sqrt(jnp.asarray(fan_in, dtype))
    # Stored as (fan_in, fan_out) = torch weight transposed, so kernels do x @ W.
    w = jax.random.uniform(kw, (fan_in, fan_out), dtype, minval=-bound, maxval=bound)
    b = jax.random.uniform(kb, (fan_out,), dtype, minval=-bound, maxval=bound)
    return w, b


if __name__ == "__main__":
    input_size = 32
    hidden_size = 32
    batch, seq = 2, 8

    key = jax.random.PRNGKey(0)
    kx, k1, k2 = jax.random.split(key, 3)

    x = jax.random.normal(kx, (batch, seq, input_size), jnp.float32)
    w1, b1 = _torch_linear_init(k1, input_size, hidden_size)
    w2, b2 = _torch_linear_init(k2, hidden_size, hidden_size)

    ffn = jax.jit(ffn_layer)
    out = jax.block_until_ready(ffn(x, w1, b1, w2, b2))

    # Reference 1: exact emulation of the kernel math (bf16 MXU operands, f32 accum).
    xb, w1b, w2b = (a.astype(jnp.bfloat16) for a in (x, w1, w2))
    h = jnp.maximum(jnp.dot(xb, w1b, preferred_element_type=jnp.float32) + b1, 0.0)
    ref_bf16 = jnp.maximum(
        jnp.dot(h.astype(jnp.bfloat16), w2b, preferred_element_type=jnp.float32) + b2,
        0.0)
    # Reference 2: pure-f32 torch-style math (loose tolerance for bf16 operands).
    ref_f32 = jnp.maximum(jnp.maximum(x @ w1 + b1, 0.0) @ w2 + b2, 0.0)

    assert out.shape == (batch, seq, hidden_size)
    assert jnp.allclose(out, ref_bf16, atol=1e-2, rtol=1e-2), \
        float(jnp.abs(out - ref_bf16).max())
    assert jnp.allclose(out, ref_f32, atol=5e-2, rtol=5e-2), \
        float(jnp.abs(out - ref_f32).max())

    print("KERNEL_OK")
</pallas_src>

<mosaic_0001>
module attributes {stable_mosaic.version = 11 : i64} {
  func.func @_ffn_fused_kernel(%arg0: i32, %arg1: memref<16x128xf32, #tpu.memory_space<vmem>>, %arg2: memref<128x128xbf16, #tpu.memory_space<vmem>>, %arg3: memref<1x128xf32, #tpu.memory_space<vmem>>, %arg4: memref<128x128xbf16, #tpu.memory_space<vmem>>, %arg5: memref<1x128xf32, #tpu.memory_space<vmem>>, %arg6: memref<16x128xf32, #tpu.memory_space<vmem>>) attributes {dimension_semantics = [#tpu.dimension_semantics<parallel>], iteration_bounds = array<i64: 1>, scalar_prefetch = 0 : i64, scratch_operands = 0 : i64, tpu.core_type = #tpu.core_type<tc>, window_params = [{transform_indices = @transform_0, window_bounds = array<i64: 16, 128>}, {pipeline_mode = #tpu.pipeline_mode<synchronous>, transform_indices = @transform_1, window_bounds = array<i64: 128, 128>}, {pipeline_mode = #tpu.pipeline_mode<synchronous>, transform_indices = @transform_2, window_bounds = array<i64: 1, 128>}, {pipeline_mode = #tpu.pipeline_mode<synchronous>, transform_indices = @transform_3, window_bounds = array<i64: 128, 128>}, {pipeline_mode = #tpu.pipeline_mode<synchronous>, transform_indices = @transform_4, window_bounds = array<i64: 1, 128>}, {transform_indices = @transform_5, window_bounds = array<i64: 16, 128>}]} {
    %c0 = arith.constant 0 : index
    %c0_0 = arith.constant 0 : index
    %0 = vector.load %arg1[%c0, %c0_0] : memref<16x128xf32, #tpu.memory_space<vmem>>, vector<16x128xf32>
    %1 = arith.truncf %0 : vector<16x128xf32> to vector<16x128xbf16>
    %c0_1 = arith.constant 0 : index
    %c0_2 = arith.constant 0 : index
    %2 = vector.load %arg2[%c0_1, %c0_2] : memref<128x128xbf16, #tpu.memory_space<vmem>>, vector<128x128xbf16>
    %cst = arith.constant dense<0.000000e+00> : vector<16x128xf32>
    %3 = tpu.matmul %1, %2, %cst {dimension_numbers = #tpu.dot_dimension_numbers<[1], [0], [0], [1], [0, 0, 1, 1], [], []>} : vector<16x128xbf16>, vector<128x128xbf16>, vector<16x128xf32> -> vector<16x128xf32>
    %c0_3 = arith.constant 0 : index
    %c0_4 = arith.constant 0 : index
    %4 = vector.load %arg3[%c0_3, %c0_4] : memref<1x128xf32, #tpu.memory_space<vmem>>, vector<1x128xf32>
    %5 = vector.broadcast %4 : vector<1x128xf32> to vector<16x128xf32>
    %6 = arith.addf %3, %5 : vector<16x128xf32>
    %cst_5 = arith.constant 0.000000e+00 : f32
    %7 = vector.broadcast %cst_5 : f32 to vector<16x128xf32>
    %8 = arith.maximumf %6, %7 : vector<16x128xf32>
    %9 = arith.truncf %8 : vector<16x128xf32> to vector<16x128xbf16>
    %c0_6 = arith.constant 0 : index
    %c0_7 = arith.constant 0 : index
    %10 = vector.load %arg4[%c0_6, %c0_7] : memref<128x128xbf16, #tpu.memory_space<vmem>>, vector<128x128xbf16>
    %cst_8 = arith.constant dense<0.000000e+00> : vector<16x128xf32>
    %11 = tpu.matmul %9, %10, %cst_8 {dimension_numbers = #tpu.dot_dimension_numbers<[1], [0], [0], [1], [0, 0, 1, 1], [], []>} : vector<16x128xbf16>, vector<128x128xbf16>, vector<16x128xf32> -> vector<16x128xf32>
    %c0_9 = arith.constant 0 : index
    %c0_10 = arith.constant 0 : index
    %12 = vector.load %arg5[%c0_9, %c0_10] : memref<1x128xf32, #tpu.memory_space<vmem>>, vector<1x128xf32>
    %13 = vector.broadcast %12 : vector<1x128xf32> to vector<16x128xf32>
    %14 = arith.addf %11, %13 : vector<16x128xf32>
    %cst_11 = arith.constant 0.000000e+00 : f32
    %15 = vector.broadcast %cst_11 : f32 to vector<16x128xf32>
    %16 = arith.maximumf %14, %15 : vector<16x128xf32>
    %c0_12 = arith.constant 0 : index
    %c0_13 = arith.constant 0 : index
    %17 = vector.load %arg6[%c0_12, %c0_13] : memref<16x128xf32, #tpu.memory_space<vmem>>, vector<16x128xf32>
    tpu.vector_store %arg6[%c0_12, %c0_13], %16 {strides = array<i32>} : memref<16x128xf32, #tpu.memory_space<vmem>>, vector<16x128xf32>,
    return
  }
  func.func @transform_0(%arg0: i32) -> (i32, i32) {
    %c0_i32 = arith.constant 0 : i32
    %c0_i32_0 = arith.constant 0 : i32
    return %arg0, %c0_i32 : i32, i32
  }
  func.func @transform_1(%arg0: i32) -> (i32, i32) {
    %c0_i32 = arith.constant 0 : i32
    %c0_i32_0 = arith.constant 0 : i32
    %c0_i32_1 = arith.constant 0 : i32
    return %c0_i32, %c0_i32_0 : i32, i32
  }
  func.func @transform_2(%arg0: i32) -> (i32, i32) {
    %c0_i32 = arith.constant 0 : i32
    %c0_i32_0 = arith.constant 0 : i32
    %c0_i32_1 = arith.constant 0 : i32
    return %c0_i32, %c0_i32_0 : i32, i32
  }
  func.func @transform_3(%arg0: i32) -> (i32, i32) {
    %c0_i32 = arith.constant 0 : i32
    %c0_i32_0 = arith.constant 0 : i32
    %c0_i32_1 = arith.constant 0 : i32
    return %c0_i32, %c0_i32_0 : i32, i32
  }
  func.func @transform_4(%arg0: i32) -> (i32, i32) {
    %c0_i32 = arith.constant 0 : i32
    %c0_i32_0 = arith.constant 0 : i32
    %c0_i32_1 = arith.constant 0 : i32
    return %c0_i32, %c0_i32_0 : i32, i32
  }
  func.func @transform_5(%arg0: i32) -> (i32, i32) {
    %c0_i32 = arith.constant 0 : i32
    %c0_i32_0 = arith.constant 0 : i32
    return %arg0, %c0_i32 : i32, i32
  }
}

</mosaic_0001>

<bundles_post_ra>
// kernel: ffn_layer.1
= control target key start
LH: loop header
LB: loop body
LE: loop exit
PB: predicated region body
PF: predicated region fallthrough
CT: control target
= control target key end

     0   :  { %s376_s1 = inlined_call_operand.vmem [shape: bf16[128,128], index: 1, kind: input, shape index: {}]   ;;  %s377_s3 = inlined_call_operand.vmem [shape: bf16[128,128], index: 3, kind: input, shape index: {}]   ;;  %s378_s2 = inlined_call_operand.vmem [shape: f32[1,128], index: 2, kind: input, shape index: {}]   ;;  %s379_s0 = inlined_call_operand.vmem [shape: f32[16,128], index: 0, kind: input, shape index: {}]   ;;  %s380_s4 = inlined_call_operand.vmem [shape: f32[1,128], index: 4, kind: input, shape index: {}]   ;;  %s381_s5 = inlined_call_operand.vmem [shape: f32[16,128], index: 5, kind: output, shape index: {}]  }
   0x1   :  { %v269_v0 = vld [vmem:[%s376_s1 + $0x38] sm:$0xff]  ;;  %v268_v1 = vld [vmem:[%s376_s1 + $0x30] sm:$0xff]  ;;  %v267_v4 = vld [vmem:[%s376_s1 + $0x28] sm:$0xff] }
   0x2   :  { %91 = vmatpush.bf16.msra.mxu0 %v269_v0  ;;  %v277_v2 = vld [vmem:[%s377_s3 + $0x38] sm:$0xff]  ;;  %v276_v3 = vld [vmem:[%s377_s3 + $0x30] sm:$0xff]  ;;  %v275_v5 = vld [vmem:[%s377_s3 + $0x28] sm:$0xff] }
   0x3   :  { %176 = vmatpush.bf16.msra.mxu1 %v277_v2  ;;  %v266_v6 = vld [vmem:[%s376_s1 + $0x20] sm:$0xff]  ;;  %v265_v8 = vld [vmem:[%s376_s1 + $0x18] sm:$0xff]  ;;  %v264_v9 = vld [vmem:[%s376_s1 + $0x10] sm:$0xff] }
   0x4   :  { %v274_v7 = vld [vmem:[%s377_s3 + $0x20] sm:$0xff]  ;;  %v263_v10 = vld [vmem:[%s376_s1 + $0x8] sm:$0xff]  ;;  %v273_v15 = vld [vmem:[%s377_s3 + $0x18] sm:$0xff] }
   0x5   :  { %v262_v11 = vld [vmem:[%s376_s1] sm:$0xff]  ;;  %v21_v13 = vld [vmem:[%s379_s0 + $0x8] sm:$0xff]  ;;  %v272_v16 = vld [vmem:[%s377_s3 + $0x10] sm:$0xff] }
   0x6   :  { %92 = vmatpush.bf16.msra.mxu0 %v268_v1  ;;  %v20_v12 = vld [vmem:[%s379_s0] sm:$0xff]  ;;  %v271_v17 = vld [vmem:[%s377_s3 + $0x8] sm:$0xff] }
   0x7   :  { %177 = vmatpush.bf16.msra.mxu1 %v276_v3  ;;  %v22_v14 = vpack.c.bf16 %v21_v13, %v20_v12  ;;  %v270_v18 = vld [vmem:[%s377_s3] sm:$0xff] }
   0x8   :  { %v278_v20 = vld [vmem:[%s378_s2] ss:$0 sm:$0xff] }
   0x9   :  { %v279_v27 = vld [vmem:[%s380_s4] ss:$0 sm:$0xff] }
   0xa   :  { %93 = vmatpush.bf16.msra.mxu0 %v267_v4 }
   0xb   :  { %178 = vmatpush.bf16.msra.mxu1 %v275_v5 }
   0xe   :  { %94 = vmatpush.bf16.msra.mxu0 %v266_v6 }
   0xf   :  { %179 = vmatpush.bf16.msra.mxu1 %v274_v7 }
  0x12   :  { %95 = vmatpush.bf16.msra.mxu0 %v265_v8 }
  0x13   :  { %180 = vmatpush.bf16.msra.mxu1 %v273_v15 }
  0x16   :  { %96 = vmatpush.bf16.msra.mxu0 %v264_v9 }
  0x17   :  { %181 = vmatpush.bf16.msra.mxu1 %v272_v16 }
  0x1a   :  { %97 = vmatpush.bf16.msra.mxu0 %v263_v10 }
  0x1b   :  { %182 = vmatpush.bf16.msra.mxu1 %v271_v17 }
  0x1e   :  { %98 = vmatpush.bf16.msra.mxu0 %v262_v11 }
  0x1f   :  { %183 = vmatpush.bf16.msra.mxu1 %v270_v18 }
  0x21   :  { %99 = vmatmul.bf16.vlgmr.msra.gmra.mxu0 %v22_v14 }
  0x9e   :  { %v100_v19 = vpop.f32.mrf.mxu0 }
  0x9f   :  { %v101_v21 = vadd.f32 %v278_v20, %v100_v19 }
  0xa1   :  { %v105_v24 = vmax.f32 %v101_v21, 0.0 }
  0xa6   :  { %v102_v22 = vpop.f32.mrf.mxu0 }
  0xa7   :  { %v103_v23 = vadd.f32 %v278_v20, %v102_v22 }
  0xa9   :  { %v106_v25 = vmax.f32 %v103_v23, 0.0 }
  0xab   :  { %v107_v26 = vpack.c.bf16 %v106_v25, %v105_v24 }
  0xad   :  { %184 = vmatmul.bf16.vlgmr.msra.gmra.mxu1 %v107_v26 }
 0x12a   :  { %v185_v28 = vpop.f32.mrf.mxu1 }
 0x12b   :  { %v186_v29 = vadd.f32 %v279_v27, %v185_v28 }
 0x12d   :  { %v190_v30 = vmax.f32 %v186_v29, 0.0 }
 0x12f   :  { %192 = vst [vmem:[%s381_s5] sm:$0xff] %v190_v30 }
 0x132   :  { %v187_v31 = vpop.f32.mrf.mxu1 }
 0x133   :  { %v188_v32 = vadd.f32 %v279_v27, %v187_v31 }
 0x135   :  { %v191_v33 = vmax.f32 %v188_v32, 0.0 }
 0x137   :  { %193 = vst [vmem:[%s381_s5 + $0x8] sm:$0xff] %v191_v33 }

</bundles_post_ra>
